<compile_context>
chip_gen: v5e
topology: v5e:2x2
jax: 0.10.0
libtpu: 0.0.40
codegen_flags: <defaults>
</compile_context>

<pallas_src>
import jax
import jax.numpy as jnp
from jax.experimental import pallas as pl
from jax.experimental.pallas import tpu as pltpu


# ----------------------------- Pallas kernel --------------------------------

def _beta_mlp_kernel(x_ref, w1_ref, b1_ref, w2_ref, b2_ref, w3_ref, b3_ref,
                     min_ref, out_ref):
    """Fused (alpha || beta) MLP forward over one batch tile.

    x_ref:   (TB, in_dim)
    w1_ref:  (in_dim, 2*h1)     b1_ref: (1, 2*h1)
    w2_ref:  (2*h1,  2*h2)      b2_ref: (1, 2*h2)      (block-diagonal)
    w3_ref:  (2*h2,  2*out)     b3_ref: (1, 2*out)     (block-diagonal)
    min_ref: (1, 2*out)  -> [min_alpha]*out ++ [min_beta]*out
    out_ref: (TB, 2*out) -> [alpha | beta]
    """
    x = x_ref[...]
    h = jnp.tanh(jnp.dot(x, w1_ref[...], preferred_element_type=jnp.float32)
                 + b1_ref[...])
    h = jnp.tanh(jnp.dot(h, w2_ref[...], preferred_element_type=jnp.float32)
                 + b2_ref[...])
    o = jnp.dot(h, w3_ref[...], preferred_element_type=jnp.float32) + b3_ref[...]
    # Numerically stable softplus, single exp + single log1p, no branches.
    sp = jnp.maximum(o, 0.0) + jnp.log1p(jnp.exp(-jnp.abs(o)))
    out_ref[...] = sp + min_ref[...]


# ----------------------------- Python wrapper --------------------------------

def _round_up(n, m):
    return ((n + m - 1) // m) * m


def _fuse_params(params, out_dim, min_alpha, min_beta):
    """Concatenate the alpha/beta MLP stacks into one block-diagonal stack."""
    aw1, bw1 = params["aw1"], params["bw1"]
    aw2, bw2 = params["aw2"], params["bw2"]
    aw3, bw3 = params["aw3"], params["bw3"]
    h1 = aw1.shape[1]
    h2 = aw2.shape[1]

    w1 = jnp.concatenate([aw1, bw1], axis=1)                       # (in, 2*h1)
    b1 = jnp.concatenate([params["ab1"], params["bb1"]], axis=1)   # (1, 2*h1)

    w2 = jnp.zeros((2 * h1, 2 * h2), jnp.float32)
    w2 = w2.at[:h1, :h2].set(aw2).at[h1:, h2:].set(bw2)            # (2*h1, 2*h2)
    b2 = jnp.concatenate([params["ab2"], params["bb2"]], axis=1)   # (1, 2*h2)

    w3 = jnp.zeros((2 * h2, 2 * out_dim), jnp.float32)
    w3 = w3.at[:h2, :out_dim].set(aw3).at[h2:, out_dim:].set(bw3)  # (2*h2, 2*out)
    b3 = jnp.concatenate([params["ab3"], params["bb3"]], axis=1)   # (1, 2*out)

    ma = 0.0 if min_alpha is None else float(min_alpha)
    mb = 0.0 if min_beta is None else float(min_beta)
    min_offs = jnp.concatenate(
        [jnp.full((1, out_dim), ma, jnp.float32),
         jnp.full((1, out_dim), mb, jnp.float32)], axis=1)         # (1, 2*out)

    return w1, b1, w2, b2, w3, b3, min_offs


def beta_mlp_forward(x, params, *, min_alpha=1.05, min_beta=1.05,
                     block_rows=512):
    """Returns (alpha, beta) — the parameters of Independent(Beta(alpha, beta), 1)."""
    # TODO(synk): the Beta / Independent distribution objects (and optional
    # distribution_transformations) have no Pallas equivalent; the kernel emits
    # the distribution parameters (alpha, beta) instead.
    batch, in_dim = x.shape
    out_dim = params["aw3"].shape[1]

    w1, b1, w2, b2, w3, b3, min_offs = _fuse_params(
        params, out_dim, min_alpha, min_beta)

    # Batch tile: multiple of 8 (sublane) and <= block_rows; pad batch to a
    # multiple of the tile so tiled BlockSpecs satisfy the (8, 128) rule.
    tb = min(int(block_rows), _round_up(batch, 8))
    tb = _round_up(tb, 8)
    batch_p = _round_up(batch, tb)
    if batch_p != batch:
        x = jnp.pad(x, ((0, batch_p - batch), (0, 0)))
    grid = (batch_p // tb,)

    def const_spec(arr):
        # Full-array block, resident across all grid steps.
        return pl.BlockSpec(arr.shape, lambda i: (0,) * arr.ndim)

    out = pl.pallas_call(
        _beta_mlp_kernel,
        out_shape=jax.ShapeDtypeStruct((batch_p, 2 * out_dim), jnp.float32),
        grid=grid,
        in_specs=[
            pl.BlockSpec((tb, in_dim), lambda i: (i, 0)),   # x: tiled over batch
            const_spec(w1), const_spec(b1),
            const_spec(w2), const_spec(b2),
            const_spec(w3), const_spec(b3),
            const_spec(min_offs),
        ],
        out_specs=pl.BlockSpec((tb, 2 * out_dim), lambda i: (i, 0)),
        compiler_params=pltpu.CompilerParams(
            dimension_semantics=("parallel",)),
    )(x, w1, b1, w2, b2, w3, b3, min_offs)

    alpha = out[:batch, :out_dim]
    beta = out[:batch, out_dim:]
    return alpha, beta


# ----------------------------- Param init ------------------------------------

def _xavier_uniform(key, fan_in, fan_out, dtype=jnp.float32):
    limit = jnp.sqrt(6.0 / (fan_in + fan_out))
    return jax.random.uniform(key, (fan_in, fan_out), dtype,
                              minval=-limit, maxval=limit)


def init_params(key, input_dim, output_dim, hidden_sizes=(32, 32)):
    h1, h2 = hidden_sizes
    keys = jax.random.split(key, 6)
    return {
        # alpha MLP
        "aw1": _xavier_uniform(keys[0], input_dim, h1),
        "ab1": jnp.zeros((1, h1), jnp.float32),
        "aw2": _xavier_uniform(keys[1], h1, h2),
        "ab2": jnp.zeros((1, h2), jnp.float32),
        "aw3": _xavier_uniform(keys[2], h2, output_dim),
        "ab3": jnp.zeros((1, output_dim), jnp.float32),
        # beta MLP
        "bw1": _xavier_uniform(keys[3], input_dim, h1),
        "bb1": jnp.zeros((1, h1), jnp.float32),
        "bw2": _xavier_uniform(keys[4], h1, h2),
        "bb2": jnp.zeros((1, h2), jnp.float32),
        "bw3": _xavier_uniform(keys[5], h2, output_dim),
        "bb3": jnp.zeros((1, output_dim), jnp.float32),
    }


def reference_forward(x, params, min_alpha=1.05, min_beta=1.05):
    def mlp(w1, b1, w2, b2, w3, b3):
        h = jnp.tanh(x @ w1 + b1)
        h = jnp.tanh(h @ w2 + b2)
        return jax.nn.softplus(h @ w3 + b3)
    a = mlp(params["aw1"], params["ab1"], params["aw2"], params["ab2"],
            params["aw3"], params["ab3"]) + min_alpha
    b = mlp(params["bw1"], params["bb1"], params["bw2"], params["bb2"],
            params["bw3"], params["bb3"]) + min_beta
    return a, b


# ----------------------------- Main -------------------------------------------

if __name__ == "__main__":
    input_dim, output_dim = 16, 8

    key = jax.random.PRNGKey(0)
    pkey, xkey1, xkey2 = jax.random.split(key, 3)
    params = init_params(pkey, input_dim, output_dim)

    # Small canonical case (single tile).
    batch = 8
    x = jax.random.normal(xkey1, (batch, input_dim), jnp.float32)
    alpha, beta = beta_mlp_forward(x, params)
    jax.block_until_ready((alpha, beta))
    a_ref, b_ref = reference_forward(x, params)
    assert alpha.shape == (batch, output_dim) and beta.shape == (batch, output_dim)
    assert jnp.allclose(alpha, a_ref, atol=1e-5, rtol=1e-5)
    assert jnp.allclose(beta, b_ref, atol=1e-5, rtol=1e-5)
    # Beta concentrations must exceed min_alpha/min_beta > 1 (mode well-defined).
    assert bool(jnp.all(alpha > 1.0)) and bool(jnp.all(beta > 1.0))

    # Multi-tile case with a ragged batch (exercises padding + grid pipeline).
    batch2 = 300
    x2 = jax.random.normal(xkey2, (batch2, input_dim), jnp.float32)
    alpha2, beta2 = beta_mlp_forward(x2, params, block_rows=128)
    jax.block_until_ready((alpha2, beta2))
    a2_ref, b2_ref = reference_forward(x2, params)
    assert alpha2.shape == (batch2, output_dim)
    assert jnp.allclose(alpha2, a2_ref, atol=1e-5, rtol=1e-5)
    assert jnp.allclose(beta2, b2_ref, atol=1e-5, rtol=1e-5)

    print("KERNEL_OK")
</pallas_src>

<mosaic_0001>
module attributes {stable_mosaic.version = 11 : i64} {
  func.func @_beta_mlp_kernel(%arg0: i32, %arg1: memref<8x16xf32, #tpu.memory_space<vmem>>, %arg2: memref<16x64xf32, #tpu.memory_space<vmem>>, %arg3: memref<1x64xf32, #tpu.memory_space<vmem>>, %arg4: memref<64x64xf32, #tpu.memory_space<vmem>>, %arg5: memref<1x64xf32, #tpu.memory_space<vmem>>, %arg6: memref<64x16xf32, #tpu.memory_space<vmem>>, %arg7: memref<1x16xf32, #tpu.memory_space<vmem>>, %arg8: memref<1x16xf32, #tpu.memory_space<vmem>>, %arg9: memref<8x16xf32, #tpu.memory_space<vmem>>) attributes {dimension_semantics = [#tpu.dimension_semantics<parallel>], iteration_bounds = array<i64: 1>, scalar_prefetch = 0 : i64, scratch_operands = 0 : i64, tpu.core_type = #tpu.core_type<tc>, window_params = [{transform_indices = @transform_0, window_bounds = array<i64: 8, 16>}, {pipeline_mode = #tpu.pipeline_mode<synchronous>, transform_indices = @transform_1, window_bounds = array<i64: 16, 64>}, {pipeline_mode = #tpu.pipeline_mode<synchronous>, transform_indices = @transform_2, window_bounds = array<i64: 1, 64>}, {pipeline_mode = #tpu.pipeline_mode<synchronous>, transform_indices = @transform_3, window_bounds = array<i64: 64, 64>}, {pipeline_mode = #tpu.pipeline_mode<synchronous>, transform_indices = @transform_4, window_bounds = array<i64: 1, 64>}, {pipeline_mode = #tpu.pipeline_mode<synchronous>, transform_indices = @transform_5, window_bounds = array<i64: 64, 16>}, {pipeline_mode = #tpu.pipeline_mode<synchronous>, transform_indices = @transform_6, window_bounds = array<i64: 1, 16>}, {pipeline_mode = #tpu.pipeline_mode<synchronous>, transform_indices = @transform_7, window_bounds = array<i64: 1, 16>}, {transform_indices = @transform_8, window_bounds = array<i64: 8, 16>}]} {
    %c0 = arith.constant 0 : index
    %c0_0 = arith.constant 0 : index
    %0 = vector.load %arg1[%c0, %c0_0] : memref<8x16xf32, #tpu.memory_space<vmem>>, vector<8x16xf32>
    %c0_1 = arith.constant 0 : index
    %c0_2 = arith.constant 0 : index
    %1 = vector.load %arg2[%c0_1, %c0_2] : memref<16x64xf32, #tpu.memory_space<vmem>>, vector<16x64xf32>
    %cst = arith.constant dense<0.000000e+00> : vector<8x64xf32>
    %2 = tpu.matmul %0, %1, %cst {dimension_numbers = #tpu.dot_dimension_numbers<[1], [0], [0], [1], [0, 0, 1, 1], [], []>} : vector<8x16xf32>, vector<16x64xf32>, vector<8x64xf32> -> vector<8x64xf32>
    %c0_3 = arith.constant 0 : index
    %c0_4 = arith.constant 0 : index
    %3 = vector.load %arg3[%c0_3, %c0_4] : memref<1x64xf32, #tpu.memory_space<vmem>>, vector<1x64xf32>
    %4 = vector.broadcast %3 : vector<1x64xf32> to vector<8x64xf32>
    %5 = arith.addf %2, %4 : vector<8x64xf32>
    %6 = math.tanh %5 : vector<8x64xf32>
    %c0_5 = arith.constant 0 : index
    %c0_6 = arith.constant 0 : index
    %7 = vector.load %arg4[%c0_5, %c0_6] : memref<64x64xf32, #tpu.memory_space<vmem>>, vector<64x64xf32>
    %cst_7 = arith.constant dense<0.000000e+00> : vector<8x64xf32>
    %8 = tpu.matmul %6, %7, %cst_7 {dimension_numbers = #tpu.dot_dimension_numbers<[1], [0], [0], [1], [0, 0, 1, 1], [], []>} : vector<8x64xf32>, vector<64x64xf32>, vector<8x64xf32> -> vector<8x64xf32>
    %c0_8 = arith.constant 0 : index
    %c0_9 = arith.constant 0 : index
    %9 = vector.load %arg5[%c0_8, %c0_9] : memref<1x64xf32, #tpu.memory_space<vmem>>, vector<1x64xf32>
    %10 = vector.broadcast %9 : vector<1x64xf32> to vector<8x64xf32>
    %11 = arith.addf %8, %10 : vector<8x64xf32>
    %12 = math.tanh %11 : vector<8x64xf32>
    %c0_10 = arith.constant 0 : index
    %c0_11 = arith.constant 0 : index
    %13 = vector.load %arg6[%c0_10, %c0_11] : memref<64x16xf32, #tpu.memory_space<vmem>>, vector<64x16xf32>
    %cst_12 = arith.constant dense<0.000000e+00> : vector<8x16xf32>
    %14 = tpu.matmul %12, %13, %cst_12 {dimension_numbers = #tpu.dot_dimension_numbers<[1], [0], [0], [1], [0, 0, 1, 1], [], []>} : vector<8x64xf32>, vector<64x16xf32>, vector<8x16xf32> -> vector<8x16xf32>
    %c0_13 = arith.constant 0 : index
    %c0_14 = arith.constant 0 : index
    %15 = vector.load %arg7[%c0_13, %c0_14] : memref<1x16xf32, #tpu.memory_space<vmem>>, vector<1x16xf32>
    %16 = vector.broadcast %15 : vector<1x16xf32> to vector<8x16xf32>
    %17 = arith.addf %14, %16 : vector<8x16xf32>
    %cst_15 = arith.constant 0.000000e+00 : f32
    %18 = vector.broadcast %cst_15 : f32 to vector<8x16xf32>
    %19 = arith.maximumf %17, %18 : vector<8x16xf32>
    %20 = math.absf %17 : vector<8x16xf32>
    %cst_16 = arith.constant 0.000000e+00 : f32
    %21 = vector.broadcast %cst_16 : f32 to vector<8x16xf32>
    %22 = arith.subf %21, %20 : vector<8x16xf32>
    %23 = math.exp %22 : vector<8x16xf32>
    %24 = math.log1p %23 : vector<8x16xf32>
    %25 = arith.addf %19, %24 : vector<8x16xf32>
    %c0_17 = arith.constant 0 : index
    %c0_18 = arith.constant 0 : index
    %26 = vector.load %arg8[%c0_17, %c0_18] : memref<1x16xf32, #tpu.memory_space<vmem>>, vector<1x16xf32>
    %27 = vector.broadcast %26 : vector<1x16xf32> to vector<8x16xf32>
    %28 = arith.addf %25, %27 : vector<8x16xf32>
    %c0_19 = arith.constant 0 : index
    %c0_20 = arith.constant 0 : index
    %29 = vector.load %arg9[%c0_19, %c0_20] : memref<8x16xf32, #tpu.memory_space<vmem>>, vector<8x16xf32>
    tpu.vector_store %arg9[%c0_19, %c0_20], %28 {strides = array<i32>} : memref<8x16xf32, #tpu.memory_space<vmem>>, vector<8x16xf32>,
    return
  }
  func.func @transform_0(%arg0: i32) -> (i32, i32) {
    %c0_i32 = arith.constant 0 : i32
    %c0_i32_0 = arith.constant 0 : i32
    return %arg0, %c0_i32 : i32, i32
  }
  func.func @transform_1(%arg0: i32) -> (i32, i32) {
    %c0_i32 = arith.constant 0 : i32
    %c0_i32_0 = arith.constant 0 : i32
    %c0_i32_1 = arith.constant 0 : i32
    return %c0_i32, %c0_i32_0 : i32, i32
  }
  func.func @transform_2(%arg0: i32) -> (i32, i32) {
    %c0_i32 = arith.constant 0 : i32
    %c0_i32_0 = arith.constant 0 : i32
    %c0_i32_1 = arith.constant 0 : i32
    return %c0_i32, %c0_i32_0 : i32, i32
  }
  func.func @transform_3(%arg0: i32) -> (i32, i32) {
    %c0_i32 = arith.constant 0 : i32
    %c0_i32_0 = arith.constant 0 : i32
    %c0_i32_1 = arith.constant 0 : i32
    return %c0_i32, %c0_i32_0 : i32, i32
  }
  func.func @transform_4(%arg0: i32) -> (i32, i32) {
    %c0_i32 = arith.constant 0 : i32
    %c0_i32_0 = arith.constant 0 : i32
    %c0_i32_1 = arith.constant 0 : i32
    return %c0_i32, %c0_i32_0 : i32, i32
  }
  func.func @transform_5(%arg0: i32) -> (i32, i32) {
    %c0_i32 = arith.constant 0 : i32
    %c0_i32_0 = arith.constant 0 : i32
    %c0_i32_1 = arith.constant 0 : i32
    return %c0_i32, %c0_i32_0 : i32, i32
  }
  func.func @transform_6(%arg0: i32) -> (i32, i32) {
    %c0_i32 = arith.constant 0 : i32
    %c0_i32_0 = arith.constant 0 : i32
    %c0_i32_1 = arith.constant 0 : i32
    return %c0_i32, %c0_i32_0 : i32, i32
  }
  func.func @transform_7(%arg0: i32) -> (i32, i32) {
    %c0_i32 = arith.constant 0 : i32
    %c0_i32_0 = arith.constant 0 : i32
    %c0_i32_1 = arith.constant 0 : i32
    return %c0_i32, %c0_i32_0 : i32, i32
  }
  func.func @transform_8(%arg0: i32) -> (i32, i32) {
    %c0_i32 = arith.constant 0 : i32
    %c0_i32_0 = arith.constant 0 : i32
    return %arg0, %c0_i32 : i32, i32
  }
}

</mosaic_0001>

<bundles_post_ra>
// kernel: tpu_custom_call.1
= control target key start
LH: loop header
LB: loop body
LE: loop exit
PB: predicated region body
PF: predicated region fallthrough
CT: control target
= control target key end

     0   :  { %13 = vsyncpa [#allocation3], 0  ;;  %s378_s0 = inlined_call_operand.hbm [shape: f32[8,16], index: 0, kind: input, shape index: {}]   ;;  %s379_s1 = inlined_call_operand.vmem [shape: f32[16,64], index: 1, kind: input, shape index: {}]   ;;  %s380_s2 = inlined_call_operand.vmem [shape: f32[1,64], index: 2, kind: input, shape index: {}]   ;;  %s381_s3 = inlined_call_operand.vmem [shape: f32[64,64], index: 3, kind: input, shape index: {}]   ;;  %s382_s4 = inlined_call_operand.vmem [shape: f32[1,64], index: 4, kind: input, shape index: {}]   ;;  %s383_s5 = inlined_call_operand.vmem [shape: f32[64,16], index: 5, kind: input, shape index: {}]   ;;  %s384_s6 = inlined_call_operand.vmem [shape: f32[1,16], index: 6, kind: input, shape index: {}]   ;;  %s385_s7 = inlined_call_operand.vmem [shape: f32[1,16], index: 7, kind: input, shape index: {}]   ;;  %s386_s8 = inlined_call_operand.hbm [shape: f32[8,16], index: 8, kind: output, shape index: {}]  }
   0x1   :  { %14 = vsyncpa [#allocation4], 0  ;;  %s20_s29 = sshll.u32 %s378_s0, 4  ;;  %s255_s30 = smov [#allocation2]   ;;  %s21_s29 = int_to_ptr.hbm [resolvable:$true] %s20_s29 }
   0x2   :  { %s22_s9 = sshll.u32 %s255_s30, 4  ;;  %s23_s9 = int_to_ptr.vmem [resolvable:$true] %s22_s9 }
   0x3   :  { %25 = dma.hbm_to_vmem [thread:$0]  %s21_s29, 128, %s23_s9, [#allocation3]  }
   0x4   :  { %251 = dma.done.wait [#allocation3], 128  }
   0x5   :  { %252 = vsyncadd [#allocation3], 4294967168  ;;  %v46_v0 = vld [vmem:[%s379_s1 + $0x8] sm:$0xff]  ;;  %v45_v1 = vld [vmem:[%s379_s1] sm:$0xff]  ;;  %vm51_vm0 = vcmask 130048   ;;  %vm88_vm1 = vcmask 523264  }
   0x6   :  { %69 = vmatpush.msra.mxu0 %v46_v0  ;;  %v44_v2 = vld [vmem:[#allocation2] sm:$0xff]  ;;  %v83_v3 = vld [vmem:[%s381_s3 + $0x38] sm:$0xff]  ;;  %v82_v4 = vld [vmem:[%s381_s3 + $0x30] sm:$0xff]  ;;  %s176_s27 = sshll.u32 %s386_s8, 4  ;;  %s177_s27 = int_to_ptr.hbm [resolvable:$true] %s176_s27 }
   0x7   :  { %100 = vmatpush.msra.mxu1 %v83_v3  ;;  %v81_v5 = vld [vmem:[%s381_s3 + $0x28] sm:$0xff]  ;;  %v80_v6 = vld [vmem:[%s381_s3 + $0x20] sm:$0xff]  ;;  %v79_v7 = vld [vmem:[%s381_s3 + $0x18] sm:$0xff] }
   0x8   :  { %70 = vmatpush.msra.mxu0 %v45_v1  ;;  %v78_v8 = vld [vmem:[%s381_s3 + $0x10] sm:$0xff]  ;;  %v77_v9 = vld [vmem:[%s381_s3 + $0x8] sm:$0xff]  ;;  %v76_v10 = vld [vmem:[%s381_s3] sm:$0xff] }
   0x9   :  { %186 = vmatmul.msk.f32.vlgmr.msra.gmra.mxu0 %vm51_vm0, %v44_v2  ;;  %101 = vmatpush.msra.mxu1 %v82_v4  ;;  %v120_v11 = vld [vmem:[%s383_s5 + $0x38] sm:$0xff]  ;;  %v119_v12 = vld [vmem:[%s383_s5 + $0x30] sm:$0xff]  ;;  %v118_v13 = vld [vmem:[%s383_s5 + $0x28] sm:$0xff] }
   0xa   :  { %136 = vmatpush.msra.mxu2 %v120_v11  ;;  %v191_v14 = vld [vmem:[%s380_s2] ss:$0 sm:$0xff]  ;;  %v116_v19 = vld [vmem:[%s383_s5 + $0x18] sm:$0xff]  ;;  %v115_v20 = vld [vmem:[%s383_s5 + $0x10] sm:$0xff] }
   0xb   :  { %102 = vmatpush.msra.mxu1 %v81_v5  ;;  %v117_v18 = vld [vmem:[%s383_s5 + $0x20] sm:$0xff]  ;;  %v114_v21 = vld [vmem:[%s383_s5 + $0x8] sm:$0xff] }
   0xc   :  { %137 = vmatpush.msra.mxu2 %v119_v12  ;;  %v113_v22 = vld [vmem:[%s383_s5] sm:$0xff] }
   0xd   :  { %103 = vmatpush.msra.mxu1 %v80_v6  ;;  %v192_v23 = vld [vmem:[%s382_s4] ss:$0 sm:$0xff] }
   0xe   :  { %138 = vmatpush.msra.mxu2 %v118_v13  ;;  %v193_v27 = vld [vmem:[%s384_s6] ss:$0 sm:$0xff]  ;;  %s256_s6 = smov [#allocation5]  }
   0xf   :  { %104 = vmatpush.msra.mxu1 %v79_v7  ;;  %v194_v42 = vld [vmem:[%s385_s7] ss:$0 sm:$0xff]  ;;  %s174_s24 = sshll.u32 %s256_s6, 4  ;;  %s175_s24 = int_to_ptr.vmem [resolvable:$true] %s174_s24 }
  0x10   :  { %139 = vmatpush.msra.mxu2 %v117_v18 }
  0x11   :  { %105 = vmatpush.msra.mxu1 %v78_v8 }
  0x12   :  { %140 = vmatpush.msra.mxu2 %v116_v19 }
  0x13   :  { %106 = vmatpush.msra.mxu1 %v77_v9 }
  0x14   :  { %141 = vmatpush.msra.mxu2 %v115_v20 }
  0x15   :  { %107 = vmatpush.msra.mxu1 %v76_v10 }
  0x16   :  { %142 = vmatpush.msra.mxu2 %v114_v21 }
  0x18   :  { %143 = vmatpush.msra.mxu2 %v113_v22 }
  0x86   :  { %v72_v15 = vpop.f32.mrf.mxu0 }
  0x87   :  { %v73_v16 = vadd.f32 %v191_v14, %v72_v15 }
  0x89   :  { %195 = vtanh.f32 %v73_v16 }
  0x8f   :  { %v196_v17 = vpop.eup %195 }
  0x90   :  { %187 = vmatmul.msk.f32.vlgmr.msra.gmra.mxu1 %vm88_vm1, %v196_v17 }
 0x10d   :  { %v109_v24 = vpop.f32.mrf.mxu1 }
 0x10e   :  { %v110_v25 = vadd.f32 %v192_v23, %v109_v24 }
 0x110   :  { %197 = vtanh.f32 %v110_v25 }
 0x116   :  { %v198_v26 = vpop.eup %197 }
 0x117   :  { %188 = vmatmul.msk.f32.vlgmr.msra.gmra.mxu2 %vm88_vm1, %v198_v26 }
 0x19a   :  { %v145_v28 = vpop.f32.mrf.mxu2 }
 0x19b   :  { %v146_v29 = vadd.f32 %v193_v27, %v145_v28 }
 0x19d   :  { %v149_v30 = vand.u32 2147483647, %v146_v29  ;;  %v148_v41 = vmax.f32 %v146_v29, 0.0 }
 0x19f   :  { %v150_v31 = vsub.f32 0.0, %v149_v30 }
 0x1a1   :  { %v151_v32 = vmul.f32 1.442695, %v150_v31 }
 0x1a3   :  { %199 = vpow2.f32 %v151_v32 }
 0x1a9   :  { %v200_v33 = vpop.eup %199 }
 0x1aa   :  { %v153_v34 = vadd.f32 1.0, %v200_v33  ;;  %v156_v35 = vmul.f32 -0.5, %v200_v33  ;;  %v159_v37 = vand.u32 2147483647, %v200_v33 }
 0x1ac   :  { %201 = vlog2.f32 %v153_v34  ;;  %v157_v36 = vadd.f32 1.0, %v156_v35  ;;  %vm160_vm2 = vcmp.lt.f32.partialorder %v159_v37, 0.0004427343 }
 0x1ae   :  { %v158_v40 = vmul.f32 %v200_v33, %v157_v36 }
 0x1b2   :  { %v202_v38 = vpop.eup %201 }
 0x1b3   :  { %v155_v39 = vmul.f32 0.6931472, %v202_v38 }
 0x1b5   :  { %v161_v43 = vsel %vm160_vm2, %v158_v40, %v155_v39 }
 0x1b6   :  { %v162_v44 = vadd.f32 %v161_v43, %v148_v41 }
 0x1b8   :  { %v167_v45 = vadd.f32 %v194_v42, %v162_v44 }
 0x1ba   :  { %168 = vst.msk [vmem:[#allocation5] sm:$0xff] %vm51_vm0, %v167_v45 }
 0x1bb   :  { %179 = dma.vmem_to_hbm [thread:$0]  %s175_s24, 128, %s177_s27, [#allocation4]  }
 0x1bc   :  { %253 = dma.done.wait [#allocation4], 128  }
 0x1bd   :  { %254 = vsyncadd [#allocation4], 4294967168 }
 0x1be   :  { %184 = vsyncpa [#allocation3], 1 }
 0x1bf   :  { %185 = vsyncpa [#allocation4], 1 }

</bundles_post_ra>
